<compile_context>
chip_gen: v6e
topology: v6e:2x2x1
jax: 0.10.0
libtpu: 0.0.40
codegen_flags: <defaults>
</compile_context>

<pallas_src>
import functools

import jax
import jax.numpy as jnp
import numpy as np
from jax.experimental import pallas as pl
from jax.experimental.pallas import tpu as pltpu


def fast_attention_kernel(x_ref, wqkv_ref, wql_ref, wkl_ref, expand_ref,
                          wr_ref, br_ref, wout_ref, bout_ref, o_ref,
                          *, heads, dim_head):
    Bt, N, dim = x_ref.shape
    inner = heads * dim_head
    M = Bt * N

    def to2(t):  # (Bt, N, C) -> (Bt*N, C)   (merges leading dims only; lane dim untouched)
        return t.reshape(M, t.shape[-1])

    def to3(t):  # (Bt*N, C) -> (Bt, N, C)
        return t.reshape(Bt, N, t.shape[-1])

    x = to2(x_ref[...])                                                   # bf16 (M, dim)

    # fused QKV projection, f32 accumulation on the MXU
    qkv = jnp.dot(x, wqkv_ref[...], preferred_element_type=jnp.float32)   # (M, 3*inner) f32
    q = qkv[:, :inner]
    k = qkv[:, inner:2 * inner]
    v = qkv[:, 2 * inner:]

    expand = expand_ref[...]                                              # (heads, inner) f32 0/1

    # ---- query attention: softmax over the sequence axis, all heads at once ----
    q_logits = jnp.dot(q.astype(jnp.bfloat16), wql_ref[...],
                       preferred_element_type=jnp.float32)                # (M, heads), scale folded
    q_logits = to3(q_logits)                                              # (Bt, N, heads)
    q_logits = q_logits - jnp.max(q_logits, axis=1, keepdims=True)
    q_exp = jnp.exp(q_logits)
    q_attn = q_exp * pl.reciprocal(jnp.sum(q_exp, axis=1, keepdims=True), approx=True)

    # expand per-head attention weights to lane width `inner` (exact 0/1 matmul, no relayout)
    q_attn_e = jnp.dot(to2(q_attn), expand, preferred_element_type=jnp.float32)   # (M, inner)
    global_q = jnp.sum(to3(q_attn_e * q), axis=1, keepdims=True)          # (Bt, 1, inner)

    # ---- key attention: keys modulated by the global query ----
    k_mod = to2(to3(k) * global_q)                                        # (M, inner) f32
    k_logits = jnp.dot(k_mod.astype(jnp.bfloat16), wkl_ref[...],
                       preferred_element_type=jnp.float32)                # (M, heads)
    k_logits = to3(k_logits)
    k_logits = k_logits - jnp.max(k_logits, axis=1, keepdims=True)
    k_exp = jnp.exp(k_logits)
    k_attn = k_exp * pl.reciprocal(jnp.sum(k_exp, axis=1, keepdims=True), approx=True)

    k_attn_e = jnp.dot(to2(k_attn), expand, preferred_element_type=jnp.float32)   # (M, inner)
    global_k = jnp.sum(to3(k_attn_e * k), axis=1, keepdims=True)          # (Bt, 1, inner)  (unmodulated k)

    # ---- r = to_r(v * global_k) + q ; out = to_out(r) ----
    u = to2(to3(v) * global_k)                                            # (M, inner)
    r = jnp.dot(u.astype(jnp.bfloat16), wr_ref[...],
                preferred_element_type=jnp.float32) + br_ref[...]         # (M, inner)
    r = r + q
    out = jnp.dot(r.astype(jnp.bfloat16), wout_ref[...],
                  preferred_element_type=jnp.float32) + bout_ref[...]     # (M, dim)
    o_ref[...] = to3(out).astype(o_ref.dtype)


def _choose_batch_tile(B, N, dim, inner, vmem_budget=24 * 1024 * 1024):
    """Largest batch tile that (a) divides B, (b) keeps per-step intermediates inside a
    VMEM budget, and (c) leaves >= 2 grid steps when B >= 2 (both v7x TensorCores busy)."""
    # rough bytes of live f32/bf16 intermediates per matmul row inside the kernel
    bytes_per_row = 56 * inner + 16 * dim + 32 * max(inner // 64, 1)
    max_rows = max(N, vmem_budget // max(bytes_per_row, 1))
    best = 1
    for bt in range(1, B + 1):
        if B % bt:
            continue
        if bt > 1 and bt * N > max_rows:
            continue
        if bt > 1 and B >= 2 and (B // bt) < 2:
            continue
        best = bt
    return best


def _vmem_estimate_bytes(Bt, N, dim, heads, dim_head):
    inner = heads * dim_head
    M = Bt * N
    io = 2 * (M * dim * 2) + 2 * (M * dim * 4)                 # double-buffered x (bf16) + out
    weights = 2 * (dim * 3 * inner * 2 + 2 * inner * heads * 2 + heads * inner * 4
                   + inner * inner * 2 + inner * 4 + inner * dim * 2 + dim * 4)
    interm = M * inner * 56 + M * heads * 32                   # f32 qkv + working tiles + casts
    return io + weights + interm


def fast_attention(x, params, *, heads, dim_head, batch_tile=None):
    B, N, dim = x.shape
    inner = heads * dim_head
    scale = dim_head ** -0.5
    out_dtype = x.dtype

    Bt = batch_tile if batch_tile is not None else _choose_batch_tile(B, N, dim, inner)
    assert B % Bt == 0, "batch tile must divide batch size"
    grid = (B // Bt,)

    f32, bf16 = jnp.float32, jnp.bfloat16
    eye_h = jnp.eye(heads, dtype=f32)

    # Head-fused (block-diagonal) weights; `scale` pre-folded into the logit weights.
    w_ql_blk = jnp.kron(eye_h, params["w_ql"].astype(f32) * scale).astype(bf16)   # (inner, heads)
    w_kl_blk = jnp.kron(eye_h, params["w_kl"].astype(f32) * scale).astype(bf16)   # (inner, heads)
    expand = jnp.kron(eye_h, jnp.ones((1, dim_head), f32))                        # (heads, inner)
    w_r_blk = jnp.kron(eye_h, params["w_r"].astype(f32)).astype(bf16)             # (inner, inner)
    b_r_full = jnp.tile(params["b_r"].astype(f32), (1, heads))                    # (1, inner)
    w_qkv = params["w_qkv"].astype(bf16)
    w_out = params["w_out"].astype(bf16)
    b_out = params["b_out"].astype(f32)
    x_bf = x.astype(bf16)

    kernel = functools.partial(fast_attention_kernel, heads=heads, dim_head=dim_head)

    vmem_limit = int(min(64 * 1024 * 1024,
                         max(32 * 1024 * 1024,
                             2 * _vmem_estimate_bytes(Bt, N, dim, heads, dim_head))))

    return pl.pallas_call(
        kernel,
        out_shape=jax.ShapeDtypeStruct((B, N, dim), out_dtype),
        grid_spec=pltpu.PrefetchScalarGridSpec(
            num_scalar_prefetch=0,
            grid=grid,
            in_specs=[
                pl.BlockSpec((Bt, N, dim), lambda b: (b, 0, 0)),        # x
                pl.BlockSpec((dim, 3 * inner), lambda b: (0, 0)),       # w_qkv
                pl.BlockSpec((inner, heads), lambda b: (0, 0)),         # w_q_logits (block-diag, scaled)
                pl.BlockSpec((inner, heads), lambda b: (0, 0)),         # w_k_logits (block-diag, scaled)
                pl.BlockSpec((heads, inner), lambda b: (0, 0)),         # head expander (0/1)
                pl.BlockSpec((inner, inner), lambda b: (0, 0)),         # w_r (block-diag)
                pl.BlockSpec((1, inner), lambda b: (0, 0)),             # b_r tiled per head
                pl.BlockSpec((inner, dim), lambda b: (0, 0)),           # w_out
                pl.BlockSpec((1, dim), lambda b: (0, 0)),               # b_out
            ],
            out_specs=pl.BlockSpec((Bt, N, dim), lambda b: (b, 0, 0)),
        ),
        compiler_params=pltpu.CompilerParams(
            dimension_semantics=("parallel",),
            vmem_limit_bytes=vmem_limit),
    )(x_bf, w_qkv, w_ql_blk, w_kl_blk, expand, w_r_blk, b_r_full, w_out, b_out)


def fast_attention_ref(x, params, *, heads, dim_head):
    """Pure-JAX reference of the PyTorch forward (no mask, no rotary), using the same
    bf16-weight / f32-accumulation mixed precision as the kernel."""
    B, N, dim = x.shape
    inner = heads * dim_head
    scale = dim_head ** -0.5
    f32, bf16 = jnp.float32, jnp.bfloat16

    w_qkv = params["w_qkv"].astype(bf16)
    w_ql = (params["w_ql"].astype(f32) * scale).astype(bf16)[:, 0]    # (Dh,)
    w_kl = (params["w_kl"].astype(f32) * scale).astype(bf16)[:, 0]    # (Dh,)
    w_r = params["w_r"].astype(bf16)
    w_out = params["w_out"].astype(bf16)

    qkv = jnp.einsum("bnd,df->bnf", x.astype(bf16), w_qkv, preferred_element_type=f32)
    q, k, v = jnp.split(qkv, 3, axis=-1)

    def split_heads(t):  # b n (h d) -> b h n d
        return t.reshape(B, N, heads, dim_head).transpose(0, 2, 1, 3)

    q, k, v = map(split_heads, (q, k, v))                            # f32 (B, H, N, Dh)
    q_aggr, k_aggr, v_aggr = q, k, v

    q_logits = jnp.einsum("bhnd,d->bhn", q.astype(bf16), w_ql, preferred_element_type=f32)
    q_attn = jax.nn.softmax(q_logits, axis=-1)
    global_q = jnp.einsum("bhn,bhnd->bhd", q_attn, q_aggr)[:, :, None, :]

    k_mod = k * global_q
    k_logits = jnp.einsum("bhnd,d->bhn", k_mod.astype(bf16), w_kl, preferred_element_type=f32)
    k_attn = jax.nn.softmax(k_logits, axis=-1)
    global_k = jnp.einsum("bhn,bhnd->bhd", k_attn, k_aggr)[:, :, None, :]

    u = v_aggr * global_k
    r = jnp.einsum("bhnd,de->bhne", u.astype(bf16), w_r, preferred_element_type=f32)
    r = r + params["b_r"].astype(f32)[0]
    r = r + q
    r = r.transpose(0, 2, 1, 3).reshape(B, N, inner)
    out = jnp.einsum("bnf,fd->bnd", r.astype(bf16), w_out, preferred_element_type=f32)
    return out + params["b_out"].astype(f32)[0]


def init_params(key, dim, heads, dim_head):
    inner = heads * dim_head
    ks = jax.random.split(key, 6)

    def lin(k, fan_in, fan_out):
        return (jax.random.normal(k, (fan_in, fan_out), jnp.float32)
                / jnp.sqrt(jnp.float32(fan_in)))

    return {
        "w_qkv": lin(ks[0], dim, 3 * inner),
        "w_ql": lin(ks[1], dim_head, 1),
        "w_kl": lin(ks[2], dim_head, 1),
        "w_r": lin(ks[3], dim_head, dim_head),
        "b_r": 0.01 * jax.random.normal(ks[4], (1, dim_head), jnp.float32),
        "w_out": lin(ks[5], inner, dim),
        "b_out": jnp.zeros((1, dim), jnp.float32),
    }


if __name__ == "__main__":
    B, N, dim = 2, 8, 32
    heads, dim_head = 2, 64

    key = jax.random.PRNGKey(0)
    kx, kp = jax.random.split(key)
    x = jax.random.normal(kx, (B, N, dim), jnp.float32)
    params = init_params(kp, dim, heads, dim_head)

    out = fast_attention(x, params, heads=heads, dim_head=dim_head)
    out = jax.block_until_ready(out)

    ref = fast_attention_ref(x, params, heads=heads, dim_head=dim_head)
    np.testing.assert_allclose(np.asarray(out), np.asarray(ref), rtol=1e-2, atol=1e-2)

    print("KERNEL_OK")
</pallas_src>

<mosaic_0001>
module attributes {stable_mosaic.version = 11 : i64} {
  func.func @fast_attention_kernel(%arg0: i32, %arg1: memref<1x8x32xbf16, #tpu.memory_space<vmem>>, %arg2: memref<32x384xbf16, #tpu.memory_space<vmem>>, %arg3: memref<128x2xbf16, #tpu.memory_space<vmem>>, %arg4: memref<128x2xbf16, #tpu.memory_space<vmem>>, %arg5: memref<2x128xf32, #tpu.memory_space<vmem>>, %arg6: memref<128x128xbf16, #tpu.memory_space<vmem>>, %arg7: memref<1x128xf32, #tpu.memory_space<vmem>>, %arg8: memref<128x32xbf16, #tpu.memory_space<vmem>>, %arg9: memref<1x32xf32, #tpu.memory_space<vmem>>, %arg10: memref<1x8x32xf32, #tpu.memory_space<vmem>>) attributes {dimension_semantics = [#tpu.dimension_semantics<parallel>], iteration_bounds = array<i64: 2>, scalar_prefetch = 0 : i64, scratch_operands = 0 : i64, tpu.core_type = #tpu.core_type<tc>, window_params = [{transform_indices = @transform_0, window_bounds = array<i64: 1, 8, 32>}, {pipeline_mode = #tpu.pipeline_mode<synchronous>, transform_indices = @transform_1, window_bounds = array<i64: 32, 384>}, {pipeline_mode = #tpu.pipeline_mode<synchronous>, transform_indices = @transform_2, window_bounds = array<i64: 128, 2>}, {pipeline_mode = #tpu.pipeline_mode<synchronous>, transform_indices = @transform_3, window_bounds = array<i64: 128, 2>}, {pipeline_mode = #tpu.pipeline_mode<synchronous>, transform_indices = @transform_4, window_bounds = array<i64: 2, 128>}, {pipeline_mode = #tpu.pipeline_mode<synchronous>, transform_indices = @transform_5, window_bounds = array<i64: 128, 128>}, {pipeline_mode = #tpu.pipeline_mode<synchronous>, transform_indices = @transform_6, window_bounds = array<i64: 1, 128>}, {pipeline_mode = #tpu.pipeline_mode<synchronous>, transform_indices = @transform_7, window_bounds = array<i64: 128, 32>}, {pipeline_mode = #tpu.pipeline_mode<synchronous>, transform_indices = @transform_8, window_bounds = array<i64: 1, 32>}, {transform_indices = @transform_9, window_bounds = array<i64: 1, 8, 32>}]} {
    %c0 = arith.constant 0 : index
    %c0_0 = arith.constant 0 : index
    %c0_1 = arith.constant 0 : index
    %0 = vector.load %arg1[%c0, %c0_0, %c0_1] : memref<1x8x32xbf16, #tpu.memory_space<vmem>>, vector<1x8x32xbf16>
    %1 = vector.shape_cast %0 : vector<1x8x32xbf16> to vector<8x32xbf16>
    %c0_2 = arith.constant 0 : index
    %c0_3 = arith.constant 0 : index
    %2 = vector.load %arg2[%c0_2, %c0_3] : memref<32x384xbf16, #tpu.memory_space<vmem>>, vector<32x384xbf16>
    %cst = arith.constant dense<0.000000e+00> : vector<8x384xf32>
    %3 = tpu.matmul %1, %2, %cst {dimension_numbers = #tpu.dot_dimension_numbers<[1], [0], [0], [1], [0, 0, 1, 1], [], []>} : vector<8x32xbf16>, vector<32x384xbf16>, vector<8x384xf32> -> vector<8x384xf32>
    %4 = vector.extract_strided_slice %3 {offsets = [0, 0], sizes = [8, 128], strides = [1, 1]} : vector<8x384xf32> to vector<8x128xf32>
    %5 = vector.extract_strided_slice %3 {offsets = [0, 128], sizes = [8, 128], strides = [1, 1]} : vector<8x384xf32> to vector<8x128xf32>
    %6 = vector.extract_strided_slice %3 {offsets = [0, 256], sizes = [8, 128], strides = [1, 1]} : vector<8x384xf32> to vector<8x128xf32>
    %c0_4 = arith.constant 0 : index
    %c0_5 = arith.constant 0 : index
    %7 = vector.load %arg5[%c0_4, %c0_5] : memref<2x128xf32, #tpu.memory_space<vmem>>, vector<2x128xf32>
    %8 = arith.truncf %4 : vector<8x128xf32> to vector<8x128xbf16>
    %c0_6 = arith.constant 0 : index
    %c0_7 = arith.constant 0 : index
    %9 = vector.load %arg3[%c0_6, %c0_7] : memref<128x2xbf16, #tpu.memory_space<vmem>>, vector<128x2xbf16>
    %cst_8 = arith.constant dense<0.000000e+00> : vector<8x2xf32>
    %10 = tpu.matmul %8, %9, %cst_8 {dimension_numbers = #tpu.dot_dimension_numbers<[1], [0], [0], [1], [0, 0, 1, 1], [], []>} : vector<8x128xbf16>, vector<128x2xbf16>, vector<8x2xf32> -> vector<8x2xf32>
    %11 = vector.shape_cast %10 : vector<8x2xf32> to vector<1x8x2xf32>
    %cst_9 = arith.constant dense<0xFF800000> : vector<1x2xf32>
    %12 = vector.multi_reduction <maximumf>, %11, %cst_9 [1] : vector<1x8x2xf32> to vector<1x2xf32>
    %13 = vector.shape_cast %12 : vector<1x2xf32> to vector<1x1x2xf32>
    %14 = vector.broadcast %13 : vector<1x1x2xf32> to vector<1x8x2xf32>
    %15 = arith.subf %11, %14 : vector<1x8x2xf32>
    %16 = math.exp %15 : vector<1x8x2xf32>
    %cst_10 = arith.constant dense<0.000000e+00> : vector<1x2xf32>
    %17 = vector.multi_reduction <add>, %16, %cst_10 [1] : vector<1x8x2xf32> to vector<1x2xf32>
    %18 = vector.shape_cast %17 : vector<1x2xf32> to vector<1x1x2xf32>
    %19 = tpu.reciprocal %18 {approx = true} : vector<1x1x2xf32> -> vector<1x1x2xf32>
    %20 = vector.broadcast %19 : vector<1x1x2xf32> to vector<1x8x2xf32>
    %21 = arith.mulf %16, %20 : vector<1x8x2xf32>
    %22 = vector.shape_cast %21 : vector<1x8x2xf32> to vector<8x2xf32>
    %cst_11 = arith.constant dense<0.000000e+00> : vector<8x128xf32>
    %23 = tpu.matmul %22, %7, %cst_11 {dimension_numbers = #tpu.dot_dimension_numbers<[1], [0], [0], [1], [0, 0, 1, 1], [], []>} : vector<8x2xf32>, vector<2x128xf32>, vector<8x128xf32> -> vector<8x128xf32>
    %24 = arith.mulf %23, %4 : vector<8x128xf32>
    %25 = vector.shape_cast %24 : vector<8x128xf32> to vector<1x8x128xf32>
    %cst_12 = arith.constant dense<0.000000e+00> : vector<1x128xf32>
    %26 = vector.multi_reduction <add>, %25, %cst_12 [1] : vector<1x8x128xf32> to vector<1x128xf32>
    %27 = vector.shape_cast %26 : vector<1x128xf32> to vector<1x1x128xf32>
    %28 = vector.shape_cast %5 : vector<8x128xf32> to vector<1x8x128xf32>
    %29 = vector.broadcast %27 : vector<1x1x128xf32> to vector<1x8x128xf32>
    %30 = arith.mulf %28, %29 : vector<1x8x128xf32>
    %31 = vector.shape_cast %30 : vector<1x8x128xf32> to vector<8x128xf32>
    %32 = arith.truncf %31 : vector<8x128xf32> to vector<8x128xbf16>
    %c0_13 = arith.constant 0 : index
    %c0_14 = arith.constant 0 : index
    %33 = vector.load %arg4[%c0_13, %c0_14] : memref<128x2xbf16, #tpu.memory_space<vmem>>, vector<128x2xbf16>
    %cst_15 = arith.constant dense<0.000000e+00> : vector<8x2xf32>
    %34 = tpu.matmul %32, %33, %cst_15 {dimension_numbers = #tpu.dot_dimension_numbers<[1], [0], [0], [1], [0, 0, 1, 1], [], []>} : vector<8x128xbf16>, vector<128x2xbf16>, vector<8x2xf32> -> vector<8x2xf32>
    %35 = vector.shape_cast %34 : vector<8x2xf32> to vector<1x8x2xf32>
    %cst_16 = arith.constant dense<0xFF800000> : vector<1x2xf32>
    %36 = vector.multi_reduction <maximumf>, %35, %cst_16 [1] : vector<1x8x2xf32> to vector<1x2xf32>
    %37 = vector.shape_cast %36 : vector<1x2xf32> to vector<1x1x2xf32>
    %38 = vector.broadcast %37 : vector<1x1x2xf32> to vector<1x8x2xf32>
    %39 = arith.subf %35, %38 : vector<1x8x2xf32>
    %40 = math.exp %39 : vector<1x8x2xf32>
    %cst_17 = arith.constant dense<0.000000e+00> : vector<1x2xf32>
    %41 = vector.multi_reduction <add>, %40, %cst_17 [1] : vector<1x8x2xf32> to vector<1x2xf32>
    %42 = vector.shape_cast %41 : vector<1x2xf32> to vector<1x1x2xf32>
    %43 = tpu.reciprocal %42 {approx = true} : vector<1x1x2xf32> -> vector<1x1x2xf32>
    %44 = vector.broadcast %43 : vector<1x1x2xf32> to vector<1x8x2xf32>
    %45 = arith.mulf %40, %44 : vector<1x8x2xf32>
    %46 = vector.shape_cast %45 : vector<1x8x2xf32> to vector<8x2xf32>
    %cst_18 = arith.constant dense<0.000000e+00> : vector<8x128xf32>
    %47 = tpu.matmul %46, %7, %cst_18 {dimension_numbers = #tpu.dot_dimension_numbers<[1], [0], [0], [1], [0, 0, 1, 1], [], []>} : vector<8x2xf32>, vector<2x128xf32>, vector<8x128xf32> -> vector<8x128xf32>
    %48 = arith.mulf %47, %5 : vector<8x128xf32>
    %49 = vector.shape_cast %48 : vector<8x128xf32> to vector<1x8x128xf32>
    %cst_19 = arith.constant dense<0.000000e+00> : vector<1x128xf32>
    %50 = vector.multi_reduction <add>, %49, %cst_19 [1] : vector<1x8x128xf32> to vector<1x128xf32>
    %51 = vector.shape_cast %50 : vector<1x128xf32> to vector<1x1x128xf32>
    %52 = vector.shape_cast %6 : vector<8x128xf32> to vector<1x8x128xf32>
    %53 = vector.broadcast %51 : vector<1x1x128xf32> to vector<1x8x128xf32>
    %54 = arith.mulf %52, %53 : vector<1x8x128xf32>
    %55 = vector.shape_cast %54 : vector<1x8x128xf32> to vector<8x128xf32>
    %56 = arith.truncf %55 : vector<8x128xf32> to vector<8x128xbf16>
    %c0_20 = arith.constant 0 : index
    %c0_21 = arith.constant 0 : index
    %57 = vector.load %arg6[%c0_20, %c0_21] : memref<128x128xbf16, #tpu.memory_space<vmem>>, vector<128x128xbf16>
    %cst_22 = arith.constant dense<0.000000e+00> : vector<8x128xf32>
    %58 = tpu.matmul %56, %57, %cst_22 {dimension_numbers = #tpu.dot_dimension_numbers<[1], [0], [0], [1], [0, 0, 1, 1], [], []>} : vector<8x128xbf16>, vector<128x128xbf16>, vector<8x128xf32> -> vector<8x128xf32>
    %c0_23 = arith.constant 0 : index
    %c0_24 = arith.constant 0 : index
    %59 = vector.load %arg7[%c0_23, %c0_24] : memref<1x128xf32, #tpu.memory_space<vmem>>, vector<1x128xf32>
    %60 = vector.broadcast %59 : vector<1x128xf32> to vector<8x128xf32>
    %61 = arith.addf %58, %60 : vector<8x128xf32>
    %62 = arith.addf %61, %4 : vector<8x128xf32>
    %63 = arith.truncf %62 : vector<8x128xf32> to vector<8x128xbf16>
    %c0_25 = arith.constant 0 : index
    %c0_26 = arith.constant 0 : index
    %64 = vector.load %arg8[%c0_25, %c0_26] : memref<128x32xbf16, #tpu.memory_space<vmem>>, vector<128x32xbf16>
    %cst_27 = arith.constant dense<0.000000e+00> : vector<8x32xf32>
    %65 = tpu.matmul %63, %64, %cst_27 {dimension_numbers = #tpu.dot_dimension_numbers<[1], [0], [0], [1], [0, 0, 1, 1], [], []>} : vector<8x128xbf16>, vector<128x32xbf16>, vector<8x32xf32> -> vector<8x32xf32>
    %c0_28 = arith.constant 0 : index
    %c0_29 = arith.constant 0 : index
    %66 = vector.load %arg9[%c0_28, %c0_29] : memref<1x32xf32, #tpu.memory_space<vmem>>, vector<1x32xf32>
    %67 = vector.broadcast %66 : vector<1x32xf32> to vector<8x32xf32>
    %68 = arith.addf %65, %67 : vector<8x32xf32>
    %69 = vector.shape_cast %68 : vector<8x32xf32> to vector<1x8x32xf32>
    %c0_30 = arith.constant 0 : index
    %c0_31 = arith.constant 0 : index
    %c0_32 = arith.constant 0 : index
    %70 = vector.load %arg10[%c0_30, %c0_31, %c0_32] : memref<1x8x32xf32, #tpu.memory_space<vmem>>, vector<1x8x32xf32>
    tpu.vector_store %arg10[%c0_30, %c0_31, %c0_32], %69 {strides = array<i32>} : memref<1x8x32xf32, #tpu.memory_space<vmem>>, vector<1x8x32xf32>,
    return
  }
  func.func @transform_0(%arg0: i32) -> (i32, i32, i32) {
    %c0_i32 = arith.constant 0 : i32
    %c0_i32_0 = arith.constant 0 : i32
    %c0_i32_1 = arith.constant 0 : i32
    return %arg0, %c0_i32, %c0_i32_0 : i32, i32, i32
  }
  func.func @transform_1(%arg0: i32) -> (i32, i32) {
    %c0_i32 = arith.constant 0 : i32
    %c0_i32_0 = arith.constant 0 : i32
    %c0_i32_1 = arith.constant 0 : i32
    return %c0_i32, %c0_i32_0 : i32, i32
  }
  func.func @transform_2(%arg0: i32) -> (i32, i32) {
    %c0_i32 = arith.constant 0 : i32
    %c0_i32_0 = arith.constant 0 : i32
    %c0_i32_1 = arith.constant 0 : i32
    return %c0_i32, %c0_i32_0 : i32, i32
  }
  func.func @transform_3(%arg0: i32) -> (i32, i32) {
    %c0_i32 = arith.constant 0 : i32
    %c0_i32_0 = arith.constant 0 : i32
    %c0_i32_1 = arith.constant 0 : i32
    return %c0_i32, %c0_i32_0 : i32, i32
  }
  func.func @transform_4(%arg0: i32) -> (i32, i32) {
    %c0_i32 = arith.constant 0 : i32
    %c0_i32_0 = arith.constant 0 : i32
    %c0_i32_1 = arith.constant 0 : i32
    return %c0_i32, %c0_i32_0 : i32, i32
  }
  func.func @transform_5(%arg0: i32) -> (i32, i32) {
    %c0_i32 = arith.constant 0 : i32
    %c0_i32_0 = arith.constant 0 : i32
    %c0_i32_1 = arith.constant 0 : i32
    return %c0_i32, %c0_i32_0 : i32, i32
  }
  func.func @transform_6(%arg0: i32) -> (i32, i32) {
    %c0_i32 = arith.constant 0 : i32
    %c0_i32_0 = arith.constant 0 : i32
    %c0_i32_1 = arith.constant 0 : i32
    return %c0_i32, %c0_i32_0 : i32, i32
  }
  func.func @transform_7(%arg0: i32) -> (i32, i32) {
    %c0_i32 = arith.constant 0 : i32
    %c0_i32_0 = arith.constant 0 : i32
    %c0_i32_1 = arith.constant 0 : i32
    return %c0_i32, %c0_i32_0 : i32, i32
  }
  func.func @transform_8(%arg0: i32) -> (i32, i32) {
    %c0_i32 = arith.constant 0 : i32
    %c0_i32_0 = arith.constant 0 : i32
    %c0_i32_1 = arith.constant 0 : i32
    return %c0_i32, %c0_i32_0 : i32, i32
  }
  func.func @transform_9(%arg0: i32) -> (i32, i32, i32) {
    %c0_i32 = arith.constant 0 : i32
    %c0_i32_0 = arith.constant 0 : i32
    %c0_i32_1 = arith.constant 0 : i32
    return %arg0, %c0_i32, %c0_i32_0 : i32, i32, i32
  }
}

</mosaic_0001>

<bundles_post_ra>
// kernel: tpu_custom_call.1
= control target key start
LH: loop header
LB: loop body
LE: loop exit
PB: predicated region body
PF: predicated region fallthrough
CT: control target
= control target key end

     0   :  { %14 = vsyncpa [#allocation3], 0  ;;  %s1867_s0 = inlined_call_operand.vmem [shape: bf16[2,8,32], index: 0, kind: input, shape index: {}]   ;;  %s1868_s1 = inlined_call_operand.vmem [shape: bf16[32,384], index: 1, kind: input, shape index: {}]   ;;  %s1869_s2 = inlined_call_operand.vmem [shape: bf16[128,2], index: 2, kind: input, shape index: {}]   ;;  %s1870_s3 = inlined_call_operand.vmem [shape: bf16[128,2], index: 3, kind: input, shape index: {}]   ;;  %s1871_s4 = inlined_call_operand.vmem [shape: f32[2,128], index: 4, kind: input, shape index: {}]   ;;  %s1872_s5 = inlined_call_operand.vmem [shape: bf16[128,128], index: 5, kind: input, shape index: {}]   ;;  %s1873_s6 = inlined_call_operand.vmem [shape: f32[1,128], index: 6, kind: input, shape index: {}]   ;;  %s1874_s7 = inlined_call_operand.vmem [shape: bf16[128,32], index: 7, kind: input, shape index: {}]   ;;  %s1875_s8 = inlined_call_operand.vmem [shape: f32[1,32], index: 8, kind: input, shape index: {}]   ;;  %s1876_s9 = inlined_call_operand.hbm [shape: f32[2,8,32], index: 9, kind: output, shape index: {}]  }
   0x1   :  { %16 = vsyncpa [#allocation3 + $0x1], 0  ;;  %s1573_s30 = smov 0   ;;  %s1575_s10 = smov 0  }
   0x2   :  { %s1577_s11 = smov 0   ;;  %s1579_s12 = smov 0  }
   0x3 LB: > { %s1594_s13 = sadd.s32 4294967295, %s1517_s12   ;;  %s1170_s14 = sadd.s32 4294967294, %s1517_s12   ;;  %s1517_s12 = sphi %s1579_s12, %s1882_s12   ;;  %s1513_s11 = sphi %s1577_s11, %s1881_s11   ;;  %s1509_s10 = sphi %s1575_s10, %s1880_s10   ;;  %s1505_s30 = sphi %s1573_s30, %s1879_s30  }
   0x4   : > { %s1598_s15 = sadd.s32 1, %s1517_s12   ;;  %s223_s16 = sadd.s32 1, %s1513_s11 }
   0x5   : > { %s220_s17 = ssub.s32 %s1517_s12, %s1598_s15  ;;  %p233_p0 = scmp.ne.s32.totalorder %s1513_s11, %s1509_s10 }
   0x6   : > { %p221_p1 = scmp.eq.s32.totalorder %s220_s17, 0  ;;  %p234_p2 = scmp.eq.s32.totalorder %s1594_s13, 1 }
   0x7   : > { %p239_p3 = scmp.ne.s32.totalorder %s1509_s10, %s1505_s30  ;;  %p240_p4 = scmp.eq.s32.totalorder %s1170_s14, 1 }
   0x8   : > { %s1609_s18 = scalar_select %p221_p1, %s1513_s11, %s223_s16  }
   0x9   : > { %p1611_p5 = por %p234_p2, %p233_p0  ;;  %p1615_p6 = por %p240_p4, %p239_p3 }
   0xa   : > { %p1173_p7 = scmp.ge.s32.totalorder %s1517_s12, 1  ;;  %p289_p8 = scmp.lt.s32.totalorder %s1517_s12, 3 }
   0xc   : > { %p290_p9 = pnand %p1173_p7, %p289_p8 }
   0xd   : > { %p324_p10 = scmp.lt.s32.totalorder (!%p290_p9), %s1594_s13, 1  ;;  %s321_s22 = sand.u32 (!%p290_p9), 1, %s1509_s10  }
   0xe   : > { %293 = sbr.rel (%p290_p9) target bundleno = 1559 (0x617), region = 56  ;;  %s1174_s23 = sshll.u32 (!%p290_p9), %s321_s22, 3 }
   0xf   : > { %s1223_s26 = sshll.u32 (!%p290_p9), %s1594_s13, 7  ;;  %s323_s27 = scalar_lea.vmem (!%p290_p9), [#allocation2], %s1174_s23 }
  0x10   : > { %s1111_s28 = sshll.u32 (!%p290_p9), %s323_s27, 4  ;;  %s1825_s16 = scalar_lea.hbm (!%p290_p9), %s1876_s9, %s1223_s26  ;;  %s1827_s28 = int_to_ptr.vmem [resolvable:$true] %s1111_s28 }
  0x11   : > { %s1098_s17 = scalar_lea.sflag (!%p290_p9), [#allocation3], %s321_s22 }
  0x13   : > { %v1409_v0 = vld [vmem:[%s1868_s1 + $0x1c] ss:$12 sps:$4 sm:$0xff]   ;;  %v1411_v1 = vld [vmem:[%s1868_s1 + $0x18] ss:$12 sps:$4 sm:$0xff]   ;;  %v1519_v2 = vmov 0   ;;  %s325_s29 = scalar_select %p324_p10, %s1594_s13, 1 }
  0x14   : > { %406 = vmatprep.mubr.bf16.mxu0 %v1519_v2  ;;  %386 = vmatprep.subr.bf16.mxu0 %v1409_v0  ;;  %v1412_v3 = vld [vmem:[%s1868_s1 + $0x4] ss:$12 sps:$4 sm:$0xff]   ;;  %v1414_v4 = vld [vmem:[%s1868_s1] ss:$12 sps:$4 sm:$0xff]   ;;  %v1520_v5 = vmov 0.0   ;;  %vm370_vm0 = vcmask 261120  }
  0x15   : > { %1269 = vmatprep.subr.bf16.mxu1 %v1520_v5  ;;  %387 = vmatpush1.bf16.msra.mxu0 %v1411_v1  ;;  %s1175_s14 = sshll.u32 %s325_s29, 2  ;;  %v1415_v6 = vld [vmem:[%s1869_s2 + $0x38] sm:$0xff]   ;;  %v1416_v8 = vld [vmem:[%s1869_s2 + $0x30] sm:$0xff]   ;;  %v1417_v9 = vld [vmem:[%s1869_s2 + $0x28] sm:$0xff]   ;;  %vm1521_vm1 = vmmov 0   ;;  %vm584_vm2 = vcmask 1041408  }
  0x16   : > { %388 = vmatprep.subr.bf16.mxu0 %v1412_v3  ;;  %s327_s21 = scalar_lea.vmem %s1867_s0, %s1175_s14  ;;  %v1418_v10 = vld [vmem:[%s1869_s2 + $0x20] sm:$0xff]   ;;  %v1419_v11 = vld [vmem:[%s1869_s2 + $0x18] sm:$0xff]   ;;  %v1420_v12 = vld [vmem:[%s1869_s2 + $0x10] sm:$0xff]   ;;  %1273 = vmatprep.mubr.msk.bf16.mxu1 %vm1521_vm1, %v1520_v5  ;;  %vm561_vm3 = vcmask 15360   ;;  %s1457_s13 = scalar_lea.vmem %s1827_s28, 128 }
  0x17   : > { %v329_v7 = vld [vmem:[%s327_s21] sm:$0xf]  ;;  %v1421_v13 = vld [vmem:[%s1869_s2 + $0x8] sm:$0xff]   ;;  %v1425_v45 = vld [vmem:[%s1870_s3 + $0x38] sm:$0xff]   ;;  %p1458_p11 = scmp.ne.s32.totalorder %s1827_s28, %s1457_s13  ;;  %s1522_s21 = smov [#allocation2]  }
  0x18   : > { %v1422_v14 = vld [vmem:[%s1869_s2] sm:$0xff]   ;;  %v1424_v21 = vld [vmem:[%s1868_s1 + $0x8] ss:$12 sps:$4 sm:$0xff]   ;;  %v1429_v54 = vld [vmem:[%s1870_s3 + $0x18] sm:$0xff]   ;;  %s1461_s23 = sshll.u32 %s1522_s21, 4  ;;  %s1462_s23 = int_to_ptr.vmem [resolvable:$false] %s1461_s23 }
  0x19   : > { %389 = vmatpush1.bf16.msra.mxu0 %v1414_v4  ;;  %v1423_v20 = vld [vmem:[%s1868_s1 + $0x20] ss:$12 sps:$4 sm:$0xff]   ;;  %v1426_v47 = vld [vmem:[%s1870_s3 + $0x30] sm:$0xff]   ;;  %p1459_p12 = pnand %p1458_p11, %p1611_p5  ;;  %s1463_s24 = scalar_lea.vmem %s1462_s23, 256 }
  0x1a   : > { %1277 = vmatprep.subr.bf16.mxu0 %v1520_v5  ;;  %1270 = vmatpush3.bf16.msra.mxu1 %v1423_v20  ;;  %v455_v22 = vld [vmem:[%s1871_s4] sm:$0x3]  ;;  %v1427_v48 = vld [vmem:[%s1870_s3 + $0x28] sm:$0xff]   ;;  %v1430_v55 = vld [vmem:[%s1870_s3 + $0x10] sm:$0xff]   ;;  %p1464_p0 = scmp.lt.s32.totalorder %s1827_s28, %s1462_s23  ;;  %p1465_p1 = scmp.lt.s32.totalorder %s1463_s24, %s1457_s13 }
  0x1b   : > { %1271 = vmatprep.subr.bf16.mxu1 %v1520_v5  ;;  %v1428_v53 = vld [vmem:[%s1870_s3 + $0x20] sm:$0xff]   ;;  %v1431_v56 = vld [vmem:[%s1870_s3 + $0x8] sm:$0xff]   ;;  %p1460_p13 = pneg %p1459_p12 }
  0x1c   : > { %1182 = vmatmul.mubr.msk.bf16.vlgmr.msra.gmra.mxu0 %vm370_vm0, %v329_v7  ;;  %v1432_v57 = vld [vmem:[%s1870_s3] sm:$0xff]   ;;  %p1466_p2 = por %p1465_p1, %p1464_p0 }
  0x1d   : > { %1278 = vmatpush3.bf16.msra.mxu0 %v1415_v6  ;;  %1293 = vmatprep.mubr.msk.bf16.mxu0 %vm1521_vm1, %v1520_v5 }
  0x1e   : > { %1279 = vmatprep.subr.bf16.mxu0 %v1520_v5  ;;  %1272 = vmatpush3.bf16.msra.mxu1 %v1424_v21  ;;  %p1467_p3 = pnand %p1466_p2, %p1460_p13 }
  0x1f   : > { %1297 = vmatprep.subr.mxu1 %v1520_v5 }
  0x21   : > { %1280 = vmatpush3.bf16.msra.mxu0 %v1416_v8  ;;  %1274 = vmatmul.mubr.msk.bf16.vlgmr.msra.gmra.mxu1 %vm370_vm0, %v329_v7 }
  0x22   : > { %1281 = vmatprep.subr.bf16.mxu0 %v1520_v5  ;;  %1298 = vmatpush3.msk.msra.mxu1 %vm584_vm2, %v455_v22 }
  0x23   : > { %1299 = vmatprep.mubr.msk.f32.mxu1 %vm1521_vm1, %v1520_v5  ;;  %1302 = vmatprep.subr.bf16.mxu1 %v1520_v5 }
  0x25   : > { %1282 = vmatpush3.bf16.msra.mxu0 %v1417_v9 }
  0x26   : > { %1283 = vmatprep.subr.bf16.mxu0 %v1520_v5 }
  0x29   : > { %1284 = vmatpush3.bf16.msra.mxu0 %v1418_v10 }
  0x2a   : > { %1285 = vmatprep.subr.bf16.mxu0 %v1520_v5 }
  0x2d   : > { %1286 = vmatpush3.bf16.msra.mxu0 %v1419_v11 }
  0x2e   : > { %1287 = vmatprep.subr.bf16.mxu0 %v1520_v5 }
  0x31   : > { %1288 = vmatpush3.bf16.msra.mxu0 %v1420_v12 }
  0x32   : > { %1289 = vmatprep.subr.bf16.mxu0 %v1520_v5 }
  0x35   : > { %1290 = vmatpush3.bf16.msra.mxu0 %v1421_v13 }
  0x36   : > { %1291 = vmatprep.subr.bf16.mxu0 %v1520_v5 }
  0x39   : > { %1292 = vmatpush3.bf16.msra.mxu0 %v1422_v14 }
  0x3a   : > { %1322 = vmatprep.subr.mxu0 %v1520_v5 }
  0xdc   : > { %v1677_v15 = vpop.f32.mrf.mxu0 }
  0xdd   : > { %v456_v16 = vpack.c.bf16 %v1677_v15, %v1677_v15 }
  0xde   : > { %v1681_v17 = vpop.f32.mrf.mxu0 }
  0xdf   : > { %1294 = vmatmul.mubr.bf16.vlgmr.msra.gmra.mxu0 %v456_v16 }
  0xe0   : > { %v412_v18 = vpop.f32.mrf.mxu0  ;;  %1324 = vmatprep.mubr.msk.f32.mxu0 %vm1521_vm1, %v1520_v5  ;;  %1323 = vmatpush3.msk.msra.mxu0 %vm584_vm2, %v455_v22 }
  0xe1   : > { %1327 = vmatprep.subr.bf16.mxu0 %v1520_v5  ;;  %v1718_v49 = vpop.f32.mrf.mxu1 }
  0xe2   : > { %v413_v19 = vpop.f32.mrf.mxu0 }
  0xe3   : > { %v1275_v50 = vpop.f32.mrf.mxu1 }
  0xe5   : > { %v452_v51 = vpop.f32.mrf.mxu1 }
  0xe7   : > { %v1276_v52 = vpop.f32.mrf.mxu1 }
 0x19f   : > { %v555_v23 = vpop.f32.mrf.mxu0 }
 0x1a0   : > { %v562_v24 = vsel %vm561_vm3, %v555_v23, -inf }
 0x1a1   : > { %v563_v25 = vrot.slane %v562_v24, 4  ;;  %v1295_v26 = vpop.f32.mrf.mxu0 }
 0x1a3   : > { %v564_v27 = vmax.f32 %v562_v24, %v563_v25  ;;  %v558_v28 = vpop.f32.mrf.mxu0 }
 0x1a5   : > { %v565_v29 = vrot.slane %v564_v27, 2  ;;  %v1296_v30 = vpop.f32.mrf.mxu0 }
 0x1a6   : > { %v1433_v30 = vld [vmem:[%s1872_s5 + $0x38] sm:$0xff]  }
 0x1a7   : > { %v566_v31 = vmax.f32 %v564_v27, %v565_v29 }
 0x1a9   : > { %v567_v32 = vrot.slane %v566_v31, 1 }
 0x1ab   : > { %v568_v33 = vmax.f32 %v566_v31, %v567_v32  ;;  %v1434_v32 = vld [vmem:[%s1872_s5 + $0x30] sm:$0xff]  }
 0x1ad   : > { %v569_v34 = vsub.f32 %v555_v23, %v568_v33  ;;  %v1435_v33 = vld [vmem:[%s1872_s5 + $0x28] sm:$0xff]  }
 0x1af   : > { %v570_v35 = vmul.f32 1.442695, %v569_v34  ;;  %v1436_v34 = vld [vmem:[%s1872_s5 + $0x20] sm:$0xff]  }
 0x1b1   : > { %1449 = vpow2.f32 %v570_v35  ;;  %v1437_v35 = vld [vmem:[%s1872_s5 + $0x18] sm:$0xff]  }
 0x1be   : > { %v1450_v36 = vpop.eup %1449 }
 0x1bf   : > { %v572_v37 = vsel %vm561_vm3, %v1450_v36, 0.0 }
 0x1c0   : > { %v573_v38 = vrot.slane %v572_v37, 4 }
 0x1c2   : > { %v574_v39 = vadd.f32 %v573_v38, %v572_v37  ;;  %v1439_v37 = vld [vmem:[%s1872_s5 + $0x8] sm:$0xff]   ;;  %v1440_v38 = vld [vmem:[%s1872_s5] sm:$0xff]  }
 0x1c4   : > { %v575_v40 = vrot.slane %v574_v39, 2 }
 0x1c6   : > { %v576_v41 = vadd.f32 %v575_v40, %v574_v39  ;;  %v1441_v39 = vld [vmem:[%s1874_s7 + $0x38] sm:$0xff]   ;;  %v1442_v40 = vld [vmem:[%s1874_s7 + $0x30] sm:$0xff]  }
 0x1c8   : > { %v577_v42 = vrot.slane %v576_v41, 1 }
 0x1ca   : > { %v578_v43 = vadd.f32 %v577_v42, %v576_v41  ;;  %v1443_v41 = vld [vmem:[%s1874_s7 + $0x28] sm:$0xff]   ;;  %v1444_v42 = vld [vmem:[%s1874_s7 + $0x20] sm:$0xff]  }
 0x1cc   : > { %1451 = vrcp.f32 %v578_v43  ;;  %v1445_v43 = vld [vmem:[%s1874_s7 + $0x18] sm:$0xff]  }
 0x1d9   : > { %v1452_v44 = vpop.eup %1451 }
 0x1da   : > { %v580_v46 = vmul.f32 %v1452_v44, %v1450_v36  ;;  %v1438_v36 = vld [vmem:[%s1872_s5 + $0x10] sm:$0xff]  }
 0x1db   : > { %v1446_v44 = vld [vmem:[%s1874_s7 + $0x10] sm:$0xff]  }
 0x1dc   : > { %1300 = vmatmul.mubr.msk.f32.vlgmr.msra.gmra.mxu1 %vm561_vm3, %v580_v46 }
 0x1dd   : > { %1303 = vmatpush3.bf16.msra.mxu1 %v1425_v45  ;;  %1318 = vmatprep.mubr.msk.bf16.mxu1 %vm1521_vm1, %v1520_v5 }
 0x1de   : > { %1304 = vmatprep.subr.bf16.mxu1 %v1520_v5 }
 0x1e1   : > { %1305 = vmatpush3.bf16.msra.mxu1 %v1426_v47 }
 0x1e2   : > { %1306 = vmatprep.subr.bf16.mxu1 %v1520_v5 }
 0x1e5   : > { %1307 = vmatpush3.bf16.msra.mxu1 %v1427_v48 }
 0x1e6   : > { %1308 = vmatprep.subr.bf16.mxu1 %v1520_v5 }
 0x1e9   : > { %1309 = vmatpush3.bf16.msra.mxu1 %v1428_v53 }
 0x1ea   : > { %1310 = vmatprep.subr.bf16.mxu1 %v1520_v5 }
 0x1ed   : > { %1311 = vmatpush3.bf16.msra.mxu1 %v1429_v54 }
 0x1ee   : > { %1312 = vmatprep.subr.bf16.mxu1 %v1520_v5 }
 0x1f1   : > { %1313 = vmatpush3.bf16.msra.mxu1 %v1430_v55 }
 0x1f2   : > { %1314 = vmatprep.subr.bf16.mxu1 %v1520_v5 }
 0x1f5   : > { %1315 = vmatpush3.bf16.msra.mxu1 %v1431_v56 }
 0x1f6   : > { %1316 = vmatprep.subr.bf16.mxu1 %v1520_v5 }
 0x1f9   : > { %1317 = vmatpush3.bf16.msra.mxu1 %v1432_v57  ;;  %v1447_v57 = vld [vmem:[%s1874_s7 + $0x8] sm:$0xff]  }
 0x1fa   : > { %1347 = vmatprep.subr.bf16.mxu1 %v1520_v5 }
 0x29c   : > { %v654_v58 = vpop.f32.mrf.mxu1 }
 0x29d   : > { %v658_v59 = vmul.f32 %v654_v58, %v1677_v15 }
 0x29e   : > { %v1301_v60 = vpop.f32.mrf.mxu1 }
 0x29f   : > { %v659_v61 = vrot.slane %v658_v59, 4 }
 0x2a1   : > { %v660_v62 = vadd.f32 %v659_v61, %v658_v59 }
 0x2a3   : > { %v661_v63 = vrot.slane %v660_v62, 2 }
 0x2a5   : > { %v662_v0 = vadd.f32 %v661_v63, %v660_v62 }
 0x2a7   : > { %v663_v1 = vrot.slane %v662_v0, 1 }
 0x2a9   : > { %v664_v2 = vadd.f32 %v663_v1, %v662_v0 }
 0x2ab   : > { %v665_v3 = vmul.f32 %v664_v2, %v1681_v17 }
 0x2ad   : > { %v666_v4 = vpack.c.bf16 %v665_v3, %v665_v3 }
 0x2af   : > { %1319 = vmatmul.mubr.bf16.vlgmr.msra.gmra.mxu1 %v666_v4 }
 0x2b0   : > { %1363 = vmatprep.mubr.msk.bf16.mxu1 %vm1521_vm1, %v1520_v5  ;;  %1348 = vmatpush3.bf16.msra.mxu1 %v1441_v39 }
 0x2b1   : > { %1349 = vmatprep.subr.bf16.mxu1 %v1520_v5 }
 0x2b4   : > { %1350 = vmatpush3.bf16.msra.mxu1 %v1442_v40 }
 0x2b5   : > { %1351 = vmatprep.subr.bf16.mxu1 %v1520_v5 }
 0x2b8   : > { %1352 = vmatpush3.bf16.msra.mxu1 %v1443_v41 }
 0x2b9   : > { %1353 = vmatprep.subr.bf16.mxu1 %v1520_v5 }
 0x2bc   : > { %1354 = vmatpush3.bf16.msra.mxu1 %v1444_v42 }
 0x2bd   : > { %1355 = vmatprep.subr.bf16.mxu1 %v1520_v5 }
 0x2c0   : > { %1356 = vmatpush3.bf16.msra.mxu1 %v1445_v43 }
 0x2c1   : > { %1357 = vmatprep.subr.bf16.mxu1 %v1520_v5 }
 0x2c4   : > { %1358 = vmatpush3.bf16.msra.mxu1 %v1446_v44 }
 0x2c5   : > { %1359 = vmatprep.subr.bf16.mxu1 %v1520_v5 }
 0x2c8   : > { %1360 = vmatpush3.bf16.msra.mxu1 %v1447_v57 }
 0x2c9   : > { %1361 = vmatprep.subr.bf16.mxu1 %v1520_v5 }
 0x36f   : > { %v765_v6 = vpop.f32.mrf.mxu1 }
 0x370   : > { %v771_v7 = vsel %vm561_vm3, %v765_v6, -inf }
 0x371   : > { %v772_v8 = vrot.slane %v771_v7, 4  ;;  %v1320_v9 = vpop.f32.mrf.mxu1 }
 0x373   : > { %v773_v10 = vmax.f32 %v771_v7, %v772_v8  ;;  %v768_v11 = vpop.f32.mrf.mxu1 }
 0x375   : > { %v774_v12 = vrot.slane %v773_v10, 2  ;;  %v1321_v13 = vpop.f32.mrf.mxu1 }
 0x377   : > { %v775_v14 = vmax.f32 %v773_v10, %v774_v12 }
 0x379   : > { %v776_v16 = vrot.slane %v775_v14, 1 }
 0x37b   : > { %v777_v18 = vmax.f32 %v775_v14, %v776_v16 }
 0x37d   : > { %v778_v19 = vsub.f32 %v765_v6, %v777_v18 }
 0x37f   : > { %v779_v20 = vmul.f32 1.442695, %v778_v19 }
 0x381   : > { %1453 = vpow2.f32 %v779_v20 }
 0x38e   : > { %v1454_v21 = vpop.eup %1453 }
 0x38f   : > { %v781_v22 = vsel %vm561_vm3, %v1454_v21, 0.0 }
 0x390   : > { %v782_v23 = vrot.slane %v781_v22, 4 }
 0x392   : > { %v783_v24 = vadd.f32 %v782_v23, %v781_v22 }
 0x394   : > { %v784_v25 = vrot.slane %v783_v24, 2 }
 0x396   : > { %v785_v26 = vadd.f32 %v784_v25, %v783_v24 }
 0x398   : > { %v786_v27 = vrot.slane %v785_v26, 1 }
 0x39a   : > { %v787_v28 = vadd.f32 %v786_v27, %v785_v26 }
 0x39c   : > { %1455 = vrcp.f32 %v787_v28 }
 0x3a9   : > { %v1456_v29 = vpop.eup %1455 }
 0x3aa   : > { %v789_v31 = vmul.f32 %v1456_v29, %v1454_v21 }
 0x3ac   : > { %1325 = vmatmul.mubr.msk.f32.vlgmr.msra.gmra.mxu0 %vm561_vm3, %v789_v31 }
 0x3ad   : > { %1328 = vmatpush3.bf16.msra.mxu0 %v1433_v30  ;;  %1343 = vmatprep.mubr.msk.bf16.mxu0 %vm1521_vm1, %v1520_v5 }
 0x3ae   : > { %1329 = vmatprep.subr.bf16.mxu0 %v1520_v5 }
 0x3b1   : > { %1330 = vmatpush3.bf16.msra.mxu0 %v1434_v32 }
 0x3b2   : > { %1331 = vmatprep.subr.bf16.mxu0 %v1520_v5 }
 0x3b5   : > { %1332 = vmatpush3.bf16.msra.mxu0 %v1435_v33 }
 0x3b6   : > { %1333 = vmatprep.subr.bf16.mxu0 %v1520_v5 }
 0x3b9   : > { %1334 = vmatpush3.bf16.msra.mxu0 %v1436_v34 }
 0x3ba   : > { %1335 = vmatprep.subr.bf16.mxu0 %v1520_v5 }
 0x3bd   : > { %1336 = vmatpush3.bf16.msra.mxu0 %v1437_v35 }
 0x3be   : > { %1337 = vmatprep.subr.bf16.mxu0 %v1520_v5 }
 0x3c1   : > { %1338 = vmatpush3.bf16.msra.mxu0 %v1438_v36 }
 0x3c2   : > { %1339 = vmatprep.subr.bf16.mxu0 %v1520_v5 }
 0x3c5   : > { %1340 = vmatpush3.bf16.msra.mxu0 %v1439_v37 }
 0x3c6   : > { %1341 = vmatprep.subr.bf16.mxu0 %v1520_v5  ;;  %v1213_v5 = vld [vmem:[%s1875_s8] ss:$0 sm:$0xff] }
 0x3c9   : > { %1342 = vmatpush3.bf16.msra.mxu0 %v1440_v38 }
 0x46c   : > { %v859_v45 = vpop.f32.mrf.mxu0 }
 0x46d   : > { %v863_v46 = vmul.f32 %v859_v45, %v1681_v17  ;;  %v1448_v17 = vld [vmem:[%s1874_s7] sm:$0xff]  }
 0x46e   : > { %v1326_v47 = vpop.f32.mrf.mxu0  ;;  %1362 = vmatpush3.bf16.msra.mxu1 %v1448_v17 }
 0x46f   : > { %v864_v48 = vrot.slane %v863_v46, 4 }
 0x471   : > { %v865_v50 = vadd.f32 %v864_v48, %v863_v46 }
 0x473   : > { %v866_v51 = vrot.slane %v865_v50, 2 }
 0x475   : > { %v867_v52 = vadd.f32 %v866_v51, %v865_v50 }
 0x477   : > { %v868_v53 = vrot.slane %v867_v52, 1 }
 0x479   : > { %v869_v54 = vadd.f32 %v868_v53, %v867_v52 }
 0x47b   : > { %v870_v55 = vmul.f32 %v869_v54, %v1718_v49  ;;  %v1204_v49 = vld [vmem:[%s1873_s6] ss:$0 sm:$0xff] }
 0x47d   : > { %v871_v56 = vpack.c.bf16 %v870_v55, %v870_v55 }
 0x47f   : > { %1344 = vmatmul.mubr.bf16.vlgmr.msra.gmra.mxu0 %v871_v56 }
 0x53f   : > { %v977_v58 = vpop.f32.mrf.mxu0 }
 0x540   : > { %v978_v59 = vadd.f32 %v1204_v49, %v977_v58 }
 0x541   : > { %v1345_v60 = vpop.f32.mrf.mxu0 }
 0x542   : > { %v983_v61 = vadd.f32 %v978_v59, %v1677_v15 }
 0x543   : > { %v980_v62 = vpop.f32.mrf.mxu0 }
 0x544   : > { %v984_v63 = vpack.c.bf16 %v983_v61, %v983_v61 }
 0x545   : > { %v1346_v0 = vpop.f32.mrf.mxu0 }
 0x546   : > { %1364 = vmatmul.mubr.bf16.vlgmr.msra.gmra.mxu1 %v984_v63 }
 0x606   : > { %v1090_v1 = vpop.f32.mrf.mxu1 }
 0x607   : > { %v1091_v2 = vadd.f32 %v1213_v5, %v1090_v1 }
 0x608   : > { %v1365_v15 = vpop.f32.mrf.mxu1 }
 0x609   : > { %1096 = vst.msk [vmem:[%s323_s27] sm:$0xff] %vm370_vm0, %v1091_v2 }
 0x60a   : > { %v1093_v3 = vpop.f32.mrf.mxu1 }
 0x60b   : > { %1470 = shalt.err (!%p1467_p3)
}
 0x60c   : > { %s1471_s25 = scalar_lea.hbm %s1825_s16, 128  ;;  %s1475_s27 = scalar_lea.hbm %s1876_s9, 256 }
 0x60d   : > { %p1472_p4 = scmp.ne.s32.totalorder %s1825_s16, %s1471_s25  ;;  %p1476_p9 = scmp.lt.s32.totalorder %s1825_s16, %s1876_s9 }
 0x60e   : > { %p1477_p10 = scmp.lt.s32.totalorder %s1475_s27, %s1471_s25 }
 0x60f   : > { %p1473_p7 = pnand %p1472_p4, %p1611_p5 }
 0x610   : > { %p1478_p11 = por %p1477_p10, %p1476_p9 }
 0x611   : > { %p1474_p8 = pneg %p1473_p7 }
 0x613   : > { %p1479_p12 = pnand %p1478_p11, %p1474_p8 }
 0x615   : > { %1482 = shalt.err (!%p1479_p12)
}
 0x616   : > { %1367 = dma.vmem_to_hbm [thread:$0]  (%p1611_p5), %s1827_s28, 128, %s1825_s16, %s1098_s17   ;;  %v1366_v4 = vpop.f32.mrf.mxu1 }
 0x617 PF: > { %p1373_p13 = scmp.ge.s32.totalorder %s1517_s12, 2  ;;  %s1123_s13 = sand.u32 1, %s1505_s30  }
 0x618   : > { %s1124_s21 = scalar_lea.sflag [#allocation3], %s1123_s13 }
 0x619   : > { %p1370_p0 = pnand %p1373_p13, %p1615_p6 }
 0x61b   : > { %p1371_p1 = pneg %p1370_p0 }
 0x61d   : > { %1500 = dma.done.wait (%p1371_p1), %s1124_s21, 128  }
 0x61e   : > { %1502 = vsyncadd (%p1371_p1), %s1124_s21, 4294967168  ;;  %p19_p2 = scmp.ge.s32.totalorder %s1598_s15, 4   ;;  %s1879_s30 = smov %s1509_s10 }
 0x61f   : > { %s1880_s10 = smov %s1513_s11  ;;  %s1881_s11 = smov %s1609_s18 }
 0x620   : > { %s1882_s12 = smov %s1598_s15  ;;  %21 = sbr.rel (!%p19_p2) target bundleno = 3 (0x3), region = 91 }
 0x625   :  { %1129 = vsyncpa [#allocation3], 1 }
 0x626   :  { %1131 = vsyncpa [#allocation3 + $0x1], 1 }

</bundles_post_ra>
